<compile_context>
chip_gen: v7x
topology: tpu7x:2x2x1
jax: 0.10.0
libtpu: 0.0.40
codegen_flags: <defaults>
</compile_context>

<pallas_src>
import functools

import jax
import jax.numpy as jnp
from jax.experimental import pallas as pl
from jax.experimental.pallas import tpu as pltpu


def _classification_tile_kernel(logits_ref, labels_ref, out_ref, *, batch):
    """One batch tile -> (1, 128) partials: lane 0 = CE-loss sum, lane 1 = #correct."""
    i = pl.program_id(0)
    x = logits_ref[...].astype(jnp.float32)                  # (TB, C) -> f32
    labels = labels_ref[...]                                  # (TB, 1) int32
    tb, c = x.shape

    # Mask rows past the real batch (ragged last tile / block padding).
    row_ids = jax.lax.broadcasted_iota(jnp.int32, (tb, 1), 0) + i * tb
    valid = row_ids < batch                                   # (TB, 1) bool

    class_ids = jax.lax.broadcasted_iota(jnp.int32, (tb, c), 1)

    # Numerically stable cross entropy.  `shifted` is computed once and reused
    # three times (exp, true-class gather, argmax tie mask) -- one fewer
    # full-tile VPU pass and one fewer (TB, C) temporary than before.
    row_max = jnp.max(x, axis=-1, keepdims=True)              # (TB, 1)
    shifted = x - row_max                                      # (TB, C)
    sum_exp = jnp.sum(jnp.exp(shifted), axis=-1, keepdims=True)
    true_shifted = jnp.sum(jnp.where(class_ids == labels, shifted, 0.0),
                           axis=-1, keepdims=True)             # (TB, 1), no one-hot temp
    per_example = jnp.log(sum_exp) - true_shifted              # = lse - true_logit
    loss_sum = jnp.sum(jnp.where(valid, per_example, 0.0))

    # Accuracy: argmax over classes, first-index tie-break (matches torch.argmax).
    masked_idx = jnp.where(shifted == 0.0, class_ids, c)
    preds = jnp.min(masked_idx, axis=-1, keepdims=True)        # (TB, 1)
    correct = jnp.logical_and(preds == labels, valid)
    corr_sum = jnp.sum(correct.astype(jnp.float32))

    # Single lane-dense (1, 128) partial store instead of two masked (1, 1) stores.
    lane = jax.lax.broadcasted_iota(jnp.int32, (1, 128), 1)
    out_ref[...] = jnp.where(lane == 0, loss_sum,
                             jnp.where(lane == 1, corr_sum, 0.0))


def _vmem_capacity_bytes():
    """Physical VMEM per TensorCore; conservative fallback if the query fails."""
    try:
        cap = getattr(pltpu.get_tpu_info(), "vmem_capacity_bytes", None)
        if cap:
            return int(cap)
    except Exception:
        pass
    return 64 << 20  # v7x per-TC physical VMEM; safe on every generation


def classification_loss_and_accuracy(logits, labels, *, block_b=None):
    """logits: (B, num_class), any float dtype (bf16/f32); labels: (B,) int class ids.
    Returns (scalar mean cross-entropy loss, scalar accuracy), both f32."""
    B, C = logits.shape
    labels_2d = labels.astype(jnp.int32).reshape(B, 1)

    itemsize = jnp.dtype(logits.dtype).itemsize
    # Sublane packing: 8 rows for 4-byte, 16 for 2-byte, 32 for 1-byte dtypes.
    pack = max(8, 32 // max(1, itemsize))

    vmem_cap = _vmem_capacity_bytes()
    if block_b is None:
        # f32-equivalent byte budget of logits per tile.  Total VMEM footprint is
        # roughly 2x input (double-buffer) + ~6x f32 temps ~= 8x this budget, so
        # cap/16 keeps us near half of physical VMEM on every generation
        # (v7x: ~4 MiB tile / ~32 MiB footprint; v5e/v6e: ~8 MiB / ~64 MiB).
        tile_budget = vmem_cap // 16
        rows = max(pack, tile_budget // (C * 4))
        block_b = max(pack, (rows // pack) * pack)
        # TODO(synk): if a single row exceeds the budget (vocab-scale C) this
        # degenerates to block_b=pack and may still exceed VMEM; needs a
        # class-axis grid with online LSE.
    if block_b >= B:
        if B >= 2 * pack:
            # Split into two tiles so the "parallel" grid axis can shard across
            # v7x's two TensorCores (HBM traffic is unchanged).
            half = (B + 1) // 2
            block_b = ((half + pack - 1) // pack) * pack
        else:
            block_b = B  # single full-batch tile (full-dim block is always legal)
    num_tiles = pl.cdiv(B, block_b)

    # Explicit scoped-VMEM limit: at least 3/4 of physical, and at least the
    # estimated tile footprint (input double-buffer + ~6 f32 temps + slack),
    # clamped below physical capacity.
    est_footprint = 2 * block_b * C * itemsize + 6 * block_b * C * 4 + (1 << 20)
    vmem_limit = int(min(max((vmem_cap * 3) // 4, est_footprint),
                         vmem_cap - (2 << 20)))

    kernel = functools.partial(_classification_tile_kernel, batch=B)
    parts = pl.pallas_call(
        kernel,
        out_shape=jax.ShapeDtypeStruct((num_tiles, 128), jnp.float32),
        grid=(num_tiles,),
        in_specs=[
            pl.BlockSpec((block_b, C), lambda i: (i, 0)),
            pl.BlockSpec((block_b, 1), lambda i: (i, 0)),
        ],
        out_specs=pl.BlockSpec((1, 128), lambda i: (i, 0)),
        compiler_params=pltpu.CompilerParams(
            dimension_semantics=("parallel",),
            vmem_limit_bytes=vmem_limit),
    )(logits, labels_2d)

    sums = jnp.sum(parts, axis=0)          # (128,): lane 0 = loss sum, lane 1 = correct
    inv_b = jnp.float32(1.0 / B)
    return sums[0] * inv_b, sums[1] * inv_b


def _reference(logits, labels):
    lp = jax.nn.log_softmax(logits.astype(jnp.float32), axis=-1)
    B = logits.shape[0]
    ref_loss = -jnp.mean(lp[jnp.arange(B), labels])
    ref_acc = jnp.mean(
        (jnp.argmax(logits.astype(jnp.float32), axis=1) == labels).astype(jnp.float32))
    return ref_loss, ref_acc


if __name__ == "__main__":
    key = jax.random.PRNGKey(0)
    k1, k2, k3, k4 = jax.random.split(key, 4)

    # Case 1: module-consistent toy shapes (batch=8, num_class=16), f32.
    B, NUM_CLASS = 8, 16
    logits = jax.random.normal(k1, (B, NUM_CLASS), dtype=jnp.float32)
    labels = jax.random.randint(k2, (B,), 0, NUM_CLASS, dtype=jnp.int32)
    loss, acc = classification_loss_and_accuracy(logits, labels)
    loss, acc = jax.block_until_ready(loss), jax.block_until_ready(acc)
    ref_loss, ref_acc = _reference(logits, labels)
    assert jnp.allclose(loss, ref_loss, atol=1e-5), (loss, ref_loss)
    assert jnp.allclose(acc, ref_acc, atol=1e-6), (acc, ref_acc)

    # Case 2: bf16 logits (native-dtype ingestion, f32 math inside the kernel).
    logits_bf16 = logits.astype(jnp.bfloat16)
    loss_b, acc_b = classification_loss_and_accuracy(logits_bf16, labels)
    loss_b = jax.block_until_ready(loss_b)
    ref_loss_b, ref_acc_b = _reference(logits_bf16, labels)
    assert jnp.allclose(loss_b, ref_loss_b, atol=1e-3), (loss_b, ref_loss_b)
    assert jnp.allclose(acc_b, ref_acc_b, atol=1e-6), (acc_b, ref_acc_b)

    # Case 3: auto-tiled multi-tile grid (B=300 -> 2 tiles, ragged last tile).
    B3, C3 = 300, 128
    logits3 = jax.random.normal(k3, (B3, C3), dtype=jnp.float32)
    labels3 = jax.random.randint(k4, (B3,), 0, C3, dtype=jnp.int32)
    loss3, acc3 = classification_loss_and_accuracy(logits3, labels3)
    loss3 = jax.block_until_ready(loss3)
    ref_loss3, ref_acc3 = _reference(logits3, labels3)
    assert jnp.allclose(loss3, ref_loss3, rtol=1e-5, atol=1e-4), (loss3, ref_loss3)
    assert jnp.allclose(acc3, ref_acc3, atol=1e-6), (acc3, ref_acc3)

    # Case 4: explicit block_b (3 tiles, ragged last tile) still works.
    loss4, acc4 = classification_loss_and_accuracy(logits3, labels3, block_b=128)
    loss4 = jax.block_until_ready(loss4)
    assert jnp.allclose(loss4, ref_loss3, rtol=1e-5, atol=1e-4), (loss4, ref_loss3)
    assert jnp.allclose(acc4, ref_acc3, atol=1e-6), (acc4, ref_acc3)

    print("KERNEL_OK")
</pallas_src>

<mosaic_0001>
module attributes {stable_mosaic.version = 11 : i64} {
  func.func @_classification_tile_kernel(%arg0: i32, %arg1: memref<8x16xf32, #tpu.memory_space<vmem>>, %arg2: memref<8x1xi32, #tpu.memory_space<vmem>>, %arg3: memref<1x128xf32, #tpu.memory_space<vmem>>) attributes {dimension_semantics = [#tpu.dimension_semantics<parallel>], iteration_bounds = array<i64: 1>, scalar_prefetch = 0 : i64, scratch_operands = 0 : i64, tpu.core_type = #tpu.core_type<tc>, window_params = [{transform_indices = @transform_0, window_bounds = array<i64: 8, 16>}, {transform_indices = @transform_1, window_bounds = array<i64: 8, 1>}, {transform_indices = @transform_2, window_bounds = array<i64: 1, 128>}]} {
    %c0 = arith.constant 0 : index
    %c0_0 = arith.constant 0 : index
    %0 = vector.load %arg1[%c0, %c0_0] : memref<8x16xf32, #tpu.memory_space<vmem>>, vector<8x16xf32>
    %c0_1 = arith.constant 0 : index
    %c0_2 = arith.constant 0 : index
    %1 = vector.load %arg2[%c0_1, %c0_2] : memref<8x1xi32, #tpu.memory_space<vmem>>, vector<8x1xi32>
    %2 = tpu.iota {dimensions = array<i32: 0>} : vector<8x1xi32>
    %c8_i32 = arith.constant 8 : i32
    %3 = arith.muli %arg0, %c8_i32 : i32
    %4 = vector.broadcast %3 : i32 to vector<8x1xi32>
    %5 = arith.addi %2, %4 : vector<8x1xi32>
    %c8_i32_3 = arith.constant 8 : i32
    %6 = vector.broadcast %c8_i32_3 : i32 to vector<8x1xi32>
    %7 = arith.cmpi slt, %5, %6 : vector<8x1xi32>
    %8 = tpu.iota {dimensions = array<i32: 1>} : vector<8x16xi32>
    %cst = arith.constant dense<0xFF800000> : vector<8xf32>
    %9 = vector.multi_reduction <maximumf>, %0, %cst [1] : vector<8x16xf32> to vector<8xf32>
    %10 = vector.shape_cast %9 : vector<8xf32> to vector<8x1xf32>
    %11 = vector.broadcast %10 : vector<8x1xf32> to vector<8x16xf32>
    %12 = arith.subf %0, %11 : vector<8x16xf32>
    %13 = math.exp %12 : vector<8x16xf32>
    %cst_4 = arith.constant dense<0.000000e+00> : vector<8xf32>
    %14 = vector.multi_reduction <add>, %13, %cst_4 [1] : vector<8x16xf32> to vector<8xf32>
    %15 = vector.shape_cast %14 : vector<8xf32> to vector<8x1xf32>
    %16 = vector.broadcast %1 : vector<8x1xi32> to vector<8x16xi32>
    %17 = arith.cmpi eq, %8, %16 : vector<8x16xi32>
    %cst_5 = arith.constant 0.000000e+00 : f32
    %18 = vector.broadcast %cst_5 : f32 to vector<8x16xf32>
    %19 = arith.select %17, %12, %18 : vector<8x16xi1>, vector<8x16xf32>
    %cst_6 = arith.constant dense<0.000000e+00> : vector<8xf32>
    %20 = vector.multi_reduction <add>, %19, %cst_6 [1] : vector<8x16xf32> to vector<8xf32>
    %21 = vector.shape_cast %20 : vector<8xf32> to vector<8x1xf32>
    %22 = math.log %15 : vector<8x1xf32>
    %23 = arith.subf %22, %21 : vector<8x1xf32>
    %cst_7 = arith.constant 0.000000e+00 : f32
    %24 = vector.broadcast %cst_7 : f32 to vector<8x1xf32>
    %25 = arith.select %7, %23, %24 : vector<8x1xi1>, vector<8x1xf32>
    %26 = vector.shape_cast %25 : vector<8x1xf32> to vector<1x8x1xf32>
    %cst_8 = arith.constant dense<0.000000e+00> : vector<1xf32>
    %27 = vector.multi_reduction <add>, %26, %cst_8 [1, 2] : vector<1x8x1xf32> to vector<1xf32>
    %28 = vector.shape_cast %27 : vector<1xf32> to vector<1x1x1xf32>
    %29 = vector.extract %28[0, 0, 0] : f32 from vector<1x1x1xf32>
    %cst_9 = arith.constant 0.000000e+00 : f32
    %30 = vector.broadcast %cst_9 : f32 to vector<8x16xf32>
    %31 = arith.cmpf oeq, %12, %30 : vector<8x16xf32>
    %c16_i32 = arith.constant 16 : i32
    %32 = vector.broadcast %c16_i32 : i32 to vector<8x16xi32>
    %33 = arith.select %31, %8, %32 : vector<8x16xi1>, vector<8x16xi32>
    %cst_10 = arith.constant dense<2147483647> : vector<8xi32>
    %34 = vector.multi_reduction <minsi>, %33, %cst_10 [1] : vector<8x16xi32> to vector<8xi32>
    %35 = vector.shape_cast %34 : vector<8xi32> to vector<8x1xi32>
    %36 = arith.cmpi eq, %35, %1 : vector<8x1xi32>
    %37 = arith.andi %36, %7 : vector<8x1xi1>
    %38 = arith.extui %37 : vector<8x1xi1> to vector<8x1xi32>
    %39 = arith.sitofp %38 : vector<8x1xi32> to vector<8x1xf32>
    %40 = vector.shape_cast %39 : vector<8x1xf32> to vector<1x8x1xf32>
    %cst_11 = arith.constant dense<0.000000e+00> : vector<1xf32>
    %41 = vector.multi_reduction <add>, %40, %cst_11 [1, 2] : vector<1x8x1xf32> to vector<1xf32>
    %42 = vector.shape_cast %41 : vector<1xf32> to vector<1x1x1xf32>
    %43 = vector.extract %42[0, 0, 0] : f32 from vector<1x1x1xf32>
    %44 = tpu.iota {dimensions = array<i32: 1>} : vector<1x128xi32>
    %c0_i32 = arith.constant 0 : i32
    %45 = vector.broadcast %c0_i32 : i32 to vector<1x128xi32>
    %46 = arith.cmpi eq, %44, %45 : vector<1x128xi32>
    %c1_i32 = arith.constant 1 : i32
    %47 = vector.broadcast %c1_i32 : i32 to vector<1x128xi32>
    %48 = arith.cmpi eq, %44, %47 : vector<1x128xi32>
    %cst_12 = arith.constant 0.000000e+00 : f32
    %49 = vector.broadcast %43 : f32 to vector<1x128xf32>
    %50 = vector.broadcast %cst_12 : f32 to vector<1x128xf32>
    %51 = arith.select %48, %49, %50 : vector<1x128xi1>, vector<1x128xf32>
    %52 = vector.broadcast %29 : f32 to vector<1x128xf32>
    %53 = arith.select %46, %52, %51 : vector<1x128xi1>, vector<1x128xf32>
    %c0_13 = arith.constant 0 : index
    %c0_14 = arith.constant 0 : index
    %54 = vector.load %arg3[%c0_13, %c0_14] : memref<1x128xf32, #tpu.memory_space<vmem>>, vector<1x128xf32>
    tpu.vector_store %arg3[%c0_13, %c0_14], %53 {strides = array<i32>} : memref<1x128xf32, #tpu.memory_space<vmem>>, vector<1x128xf32>,
    return
  }
  func.func @transform_0(%arg0: i32) -> (i32, i32) {
    %c0_i32 = arith.constant 0 : i32
    %c0_i32_0 = arith.constant 0 : i32
    return %arg0, %c0_i32 : i32, i32
  }
  func.func @transform_1(%arg0: i32) -> (i32, i32) {
    %c0_i32 = arith.constant 0 : i32
    %c0_i32_0 = arith.constant 0 : i32
    return %arg0, %c0_i32 : i32, i32
  }
  func.func @transform_2(%arg0: i32) -> (i32, i32) {
    %c0_i32 = arith.constant 0 : i32
    %c0_i32_0 = arith.constant 0 : i32
    return %arg0, %c0_i32 : i32, i32
  }
}

</mosaic_0001>

<bundles_post_ra>
// kernel: tpu_custom_call.1
= control target key start
LH: loop header
LB: loop body
LE: loop exit
PB: predicated region body
PF: predicated region fallthrough
CT: control target
= control target key end

     0   :  { %vm22_vm0 = vcmask 130048   ;;  %s191_s0 = inlined_call_operand.vmem [shape: f32[8,16], index: 0, kind: input, shape index: {}]   ;;  %s192_s1 = inlined_call_operand.vmem [shape: s32[8,1], index: 1, kind: input, shape index: {}]   ;;  %s193_s2 = inlined_call_operand.hbm [shape: f32[1,128], index: 2, kind: output, shape index: {}]  }
   0x1   :  { %v12_v0 = vld [vmem:[%s191_s0] sm:$0xff] }
   0x2   :  { %v13_v1 = vld [vmem:[%s192_s1] sm:$0xff] }
   0x3   :  { %7 = vsyncpa [#allocation3], 0  ;;  %v23_v2 = vsel %vm22_vm0, %v12_v0, -inf  ;;  %v145_v3 = vmov 0   ;;  %v20_v4 = vlaneseq  ;;  %vm44_vm4 = vcmask 7168   ;;  %s147_s1 = smov [#allocation2]  }
   0x4   :  { %115 = vset.pattern.permute.xlu1 %v145_v3  ;;  %116 = vset.pattern.permute.xlu0 %v145_v3  ;;  %v146_v33 = vmov 0.0   ;;  %s99_s13 = sshll.u32 %s147_s1, 4  ;;  %s100_s13 = int_to_ptr.vmem [resolvable:$true] %s99_s13 }
   0x5   :  { %24 = vmax.xlane.f32.xlu0 %v23_v2  ;;  %33 = vperm.xlu1 %115, %v13_v1   ;;  %v170_v7 = vand.u32 127, %v20_v4  ;;  %s121_s15 = scalar_lea.vmem %s100_s13, 16  ;;  %s125_s16 = scalar_lea.vmem %s100_s13, 32 }
   0x6   :  { %p122_p0 = scmp.ne.s32.totalorder %s100_s13, %s121_s15  ;;  %p126_p1 = scmp.lt.s32.totalorder %s100_s13, %s100_s13 }
   0x7   :  { %vm87_vm6 = vcmp.eq.s32.totalorder %v170_v7, 1  ;;  %vm86_vm7 = vcmp.eq.s32.totalorder %v170_v7, 0  ;;  %p127_p2 = scmp.lt.s32.totalorder %s125_s16, %s121_s15 }
   0x9   :  { %p128_p3 = por %p127_p2, %p126_p1 }
   0xb   :  { %p129_p4 = pnand %p128_p3, %p122_p0 }
  0x84   :  { %v34_v16 = vpop.permute.xlu1 %33 }
  0x85   :  { %vm35_vm2 = vcmp.eq.s32.totalorder %v170_v7, %v34_v16 }
  0x92   :  { %v25_v5 = vpop.xlane.xlu0 %24 }
  0x93   :  { %v26_v6 = vsub.f32 %v12_v0, %v25_v5 }
  0x95   :  { %v27_v8 = vmul.f32 1.442695, %v26_v6  ;;  %vm55_vm1 = vcmp.eq.f32.partialorder %v26_v6, 0.0  ;;  %v36_v20 = vsel %vm35_vm2, %v26_v6, 0.0 }
  0x96   :  { %v56_v9 = vsel %vm55_vm1, %v170_v7, 16  ;;  %v37_v21 = vsel %vm22_vm0, %v36_v20, 0.0 }
  0x97   :  { %117 = vpow2.f32 %v27_v8  ;;  %v57_v10 = vsel %vm22_vm0, %v56_v9, 2147483647 }
  0x98   :  { %v59_v11 = vshra.s32 %v57_v10, 16  ;;  %v58_v15 = vand.u32 65535, %v57_v10 }
  0x9a   :  { %v61_v12 = vcvt.s32.f32 %v59_v11  ;;  %v60_v18 = vcvt.s32.f32 %v58_v15 }
  0x9c   :  { %62 = vmin.xlane.f32.xlu0 %v61_v12 }
  0xa1   :  { %v118_v13 = vpop.eup %117 }
  0xa2   :  { %v29_v14 = vsel %vm22_vm0, %v118_v13, 0.0 }
  0xa3   :  { %30 = vadd.xlane.f32.xlu1 %v29_v14 }
 0x129   :  { %v63_v17 = vpop.xlane.xlu0 %62 }
 0x12a   :  { %vm64_vm3 = vcmp.eq.f32.partialorder %v61_v12, %v63_v17  ;;  %v69_v23 = vcvt.f32.s32 %v63_v17 }
 0x12b   :  { %v65_v19 = vsel %vm64_vm3, %v60_v18, inf }
 0x12c   :  { %66 = vmin.xlane.f32.xlu0 %v65_v19  ;;  %v70_v26 = vshll.u32 %v69_v23, 16 }
 0x130   :  { %38 = vadd.xlane.f32.xlu0 %v37_v21  ;;  %v31_v22 = vpop.xlane.xlu1 %30 }
 0x131   :  { %119 = vlog2.f32 %v31_v22 }
 0x13b   :  { %v120_v24 = vpop.eup %119 }
 0x13c   :  { %v41_v29 = vmul.f32 0.6931472, %v120_v24 }
 0x1b9   :  { %v67_v25 = vpop.xlane.xlu0 %66 }
 0x1ba   :  { %v68_v27 = vcvt.f32.s32 %v67_v25 }
 0x1bc   :  { %v71_v28 = vadd.s32 %v70_v26, %v68_v27 }
 0x1bd   :  { %v39_v30 = vpop.xlane.xlu0 %38 }
 0x1be   :  { %v42_v31 = vsub.f32 %v41_v29, %v39_v30  ;;  %vm72_vm5 = vcmp.eq.s32.totalorder %v71_v28, %v13_v1 }
 0x1bf   :  { %v107_v34 = vsel %vm72_vm5, 1.0, %v146_v33 }
 0x1c0   :  { %v45_v32 = vsel %vm44_vm4, %v42_v31, 0.0  ;;  %v76_v35 = vsel %vm44_vm4, %v107_v34, 0.0 }
 0x1c1   :  { %46 = vadd.xlane.f32.xlu0 %v45_v32 }
 0x1c5   :  { %77 = vadd.xlane.f32.xlu0 %v76_v35 }
 0x24e   :  { %v47_v36 = vpop.xlane.xlu0 %46 }
 0x24f   :  { %v48_v37 = vrot.slane %v47_v36, 4 }
 0x251   :  { %v49_v38 = vadd.f32 %v48_v37, %v47_v36 }
 0x252   :  { %v78_v39 = vpop.xlane.xlu0 %77 }
 0x253   :  { %v50_v40 = vrot.slane %v49_v38, 2  ;;  %v79_v41 = vrot.slane %v78_v39, 4 }
 0x255   :  { %v80_v42 = vadd.f32 %v79_v41, %v78_v39  ;;  %v51_v43 = vadd.f32 %v50_v40, %v49_v38 }
 0x257   :  { %v81_v44 = vrot.slane %v80_v42, 2  ;;  %v52_v45 = vrot.slane %v51_v43, 1 }
 0x259   :  { %v82_v46 = vadd.f32 %v81_v44, %v80_v42  ;;  %v53_v47 = vadd.f32 %v52_v45, %v51_v43 }
 0x25b   :  { %108 = vpush %v53_v47  ;;  %v83_v48 = vrot.slane %v82_v46, 1 }
 0x25d   :  { %v84_v49 = vadd.f32 %v83_v48, %v82_v46 }
 0x25f   :  { %110 = vpush %v84_v49 }
 0x28c   :  { %s109_s0 = spop %108 }
 0x28d   :  { %v90_v51 = vstv %s109_s0 }
 0x290   :  { %s111_s14 = spop %110 }
 0x291   :  { %v88_v50 = vstv %s111_s14 }
 0x292   :  { %v89_v52 = vsel %vm87_vm6, %v88_v50, 0.0 }
 0x293   :  { %v91_v53 = vsel %vm86_vm7, %v90_v51, %v89_v52 }
 0x294   :  { %92 = vst [vmem:[#allocation2] sm:$0x1] %v91_v53 }
 0x295   :  { %132 = shalt.err (!%p129_p4)
}
 0x296   :  { %s133_s19 = scalar_lea.hbm %s193_s2, 16 }
 0x297   :  { %p134_p5 = scmp.ne.s32.totalorder %s193_s2, %s133_s19  ;;  %p137_p6 = scmp.lt.u32.totalorder %s133_s19, %s193_s2 }
 0x299   :  { %p139_p7 = pnand %p137_p6, %p134_p5 }
 0x29b   :  { %142 = shalt.err (!%p139_p7)
}
 0x29c   :  { %102 = dma.vmem_to_hbm [thread:$0]  %s100_s13, 16, %s193_s2, [#allocation3]  }
 0x29d   :  { %143 = dma.done.wait [#allocation3], 16  }
 0x29e   :  { %144 = vsyncadd [#allocation3], 4294967280 }
 0x29f   :  { %106 = vsyncpa [#allocation3], 1 }

</bundles_post_ra>
